<compile_context>
chip_gen: v5e
topology: v5e:2x2
jax: 0.10.0
libtpu: 0.0.40
codegen_flags: <defaults>
</compile_context>

<pallas_src>
import jax
import jax.numpy as jnp
from jax.experimental import pallas as pl
from jax.experimental.pallas import tpu as pltpu

LANE = 128
SUB = 8
CHUNK = SUB * LANE                      # locations per dense (8,128) f32 slab
TARGET_BLOCK_BYTES = 2 * 1024 * 1024    # ~2 MiB of input streamed per grid step (fits default VMEM on all gens)
NUM_CORE_SPLITS = 2                     # leading "parallel" axis for v7x megacore; serial elsewhere


def _make_kernel(hw_true, r8, needs_mask):
    block_locs = r8 * CHUNK

    def kernel(cls_ref, lab_ref, bp_ref, bt_ref, out_ref):
        c = pl.program_id(0)
        s = pl.program_id(1)

        @pl.when(s == 0)
        def _():
            out_ref[...] = jnp.zeros_like(out_ref)

        logits = cls_ref[...]            # (N, 2, r8, 8, 128) f32
        lab = lab_ref[...]               # (N, r8, 8, 128)    f32 in {0,1} (0 in padding)
        bp = bp_ref[...]                 # (N, 4, r8, 8, 128) cx,cy,w,h
        bt = bt_ref[...]                 # (N, 4, r8, 8, 128)

        pos_b = lab > 0.5
        pos_f = pos_b.astype(jnp.float32)

        # ---- 2-class softmax CE, stable softplus form: lse - sel = softplus(other - sel) ----
        l_neg = logits[:, 0]
        l_pos = logits[:, 1]
        d = jnp.where(pos_b, l_neg - l_pos, l_pos - l_neg)
        ce = jnp.maximum(d, 0.0) + jnp.log(1.0 + jnp.exp(-jnp.abs(d)))

        if needs_mask:
            # mask CE at padded locations (labels/boxes are zero-padded, so pos/l1/giou are safe)
            base = (c * pl.num_programs(1) + s) * block_locs
            off = (jax.lax.broadcasted_iota(jnp.int32, (r8, SUB, LANE), 0) * CHUNK
                   + jax.lax.broadcasted_iota(jnp.int32, (r8, SUB, LANE), 1) * LANE
                   + jax.lax.broadcasted_iota(jnp.int32, (r8, SUB, LANE), 2))
            valid = ((base + off) < hw_true).astype(jnp.float32)    # (r8,8,128), broadcasts over N
            ce = ce * valid

        # ---- L1 bbox loss at positives ----
        l1 = jnp.sum(jnp.abs(bp - bt), axis=1) * pos_f              # (N, r8, 8, 128)

        # ---- GIoU loss (cxcywh -> xyxy) at positives, NaN-safe denominators ----
        eps = 1e-7
        px1 = bp[:, 0] - bp[:, 2] * 0.5
        px2 = bp[:, 0] + bp[:, 2] * 0.5
        py1 = bp[:, 1] - bp[:, 3] * 0.5
        py2 = bp[:, 1] + bp[:, 3] * 0.5
        tx1 = bt[:, 0] - bt[:, 2] * 0.5
        tx2 = bt[:, 0] + bt[:, 2] * 0.5
        ty1 = bt[:, 1] - bt[:, 3] * 0.5
        ty2 = bt[:, 1] + bt[:, 3] * 0.5
        area_p = (px2 - px1) * (py2 - py1)
        area_t = (tx2 - tx1) * (ty2 - ty1)
        iw = jnp.maximum(jnp.minimum(px2, tx2) - jnp.maximum(px1, tx1), 0.0)
        ih = jnp.maximum(jnp.minimum(py2, ty2) - jnp.maximum(py1, ty1), 0.0)
        inter = iw * ih
        union = area_p + area_t - inter
        iou = inter / jnp.where(pos_b, union + eps, 1.0)
        ew = jnp.maximum(px2, tx2) - jnp.minimum(px1, tx1)
        eh = jnp.maximum(py2, ty2) - jnp.minimum(py1, ty1)
        enc = ew * eh
        giou = iou - (enc - union) / jnp.where(pos_b, enc + eps, 1.0)
        giou_loss = jnp.where(pos_b, 1.0 - giou, 0.0)

        # ---- block-local (8,128) partials (leading-dim VALU adds), one dense RMW per loss ----
        def _acc(x):                                                 # (N, r8, 8, 128) -> (8, 128)
            return jnp.sum(x.reshape(-1, SUB, LANE), axis=0)

        out_ref[0, 0] += _acc(ce)
        out_ref[0, 1] += _acc(l1)
        out_ref[0, 2] += _acc(giou_loss)
        out_ref[0, 3] += _acc(pos_f)

    return kernel


def _feature_map_losses(cls_logits, cls_label, bbox_pred, bbox_target):
    """cls_logits [N,2,H,W], cls_label [N,H,W] in {0,1}, bbox_pred/target [N,4,H,W] (cxcywh)."""
    N, C, H, W = cls_logits.shape
    assert C == 2
    HW = H * W
    L = N * HW

    # NCHW kept; only contiguous reshapes (free) + optional zero-pad of the spatial tail.
    cls_f = cls_logits.astype(jnp.float32).reshape(N, 2, HW)
    lab_f = cls_label.astype(jnp.float32).reshape(N, HW)
    bp_f = bbox_pred.astype(jnp.float32).reshape(N, 4, HW)
    bt_f = bbox_target.astype(jnp.float32).reshape(N, 4, HW)

    S8 = pl.cdiv(HW, CHUNK)                                   # (8,128) slabs per image
    bytes_per_slab = N * (2 + 1 + 4 + 4) * CHUNK * 4          # all inputs for one slab column
    r8 = max(1, min(S8, TARGET_BLOCK_BYTES // bytes_per_slab))
    n_blocks = pl.cdiv(S8, r8)
    nsplit = NUM_CORE_SPLITS if (n_blocks % NUM_CORE_SPLITS == 0) else 1
    blocks_per_core = n_blocks // nsplit
    S8_pad = n_blocks * r8
    HW_pad = S8_pad * CHUNK
    needs_mask = HW_pad != HW

    if needs_mask:
        pad = HW_pad - HW
        cls_f = jnp.pad(cls_f, ((0, 0), (0, 0), (0, pad)))
        lab_f = jnp.pad(lab_f, ((0, 0), (0, pad)))
        bp_f = jnp.pad(bp_f, ((0, 0), (0, 0), (0, pad)))
        bt_f = jnp.pad(bt_f, ((0, 0), (0, 0), (0, pad)))

    cls5 = cls_f.reshape(N, 2, S8_pad, SUB, LANE)
    lab4 = lab_f.reshape(N, S8_pad, SUB, LANE)
    bp5 = bp_f.reshape(N, 4, S8_pad, SUB, LANE)
    bt5 = bt_f.reshape(N, 4, S8_pad, SUB, LANE)

    def in_idx5(c, s):
        return (0, 0, c * blocks_per_core + s, 0, 0)

    def in_idx4(c, s):
        return (0, c * blocks_per_core + s, 0, 0)

    kernel = _make_kernel(HW, r8, needs_mask)

    out = pl.pallas_call(
        kernel,
        out_shape=jax.ShapeDtypeStruct((nsplit, 4, SUB, LANE), jnp.float32),
        grid_spec=pltpu.PrefetchScalarGridSpec(
            num_scalar_prefetch=0,
            grid=(nsplit, blocks_per_core),
            in_specs=[
                pl.BlockSpec((N, 2, r8, SUB, LANE), in_idx5),
                pl.BlockSpec((N, r8, SUB, LANE), in_idx4),
                pl.BlockSpec((N, 4, r8, SUB, LANE), in_idx5),
                pl.BlockSpec((N, 4, r8, SUB, LANE), in_idx5),
            ],
            out_specs=pl.BlockSpec((1, 4, SUB, LANE), lambda c, s: (c, 0, 0, 0)),
        ),
        compiler_params=pltpu.CompilerParams(
            dimension_semantics=("parallel", "arbitrary")),
    )(cls5, lab4, bp5, bt5)

    totals = jnp.sum(out, axis=(0, 2, 3))                     # tiny (nsplit,4,8,128) -> (4,) reduce
    ce_sum, l1_sum, giou_sum, npos = totals[0], totals[1], totals[2], totals[3]
    # TODO(synk): distributed TransT all-reduces num_pos across data-parallel replicas; single-device here.
    num_pos = jnp.maximum(npos, 1.0)
    return {
        "loss_ce": ce_sum / jnp.float32(L),   # mean CE over all feature-map locations
        "loss_bbox": l1_sum / num_pos,        # mean L1 over positive locations
        "loss_giou": giou_sum / num_pos,      # mean GIoU loss over positive locations
    }


def do_statistic(loss_dict, weight_dict):
    weighted = {k: loss_dict[k] * weight_dict[k] for k in loss_dict}
    unweighted = dict(loss_dict)
    return weighted, unweighted


class SingleScaleFeatureMapCriterion:
    """JAX/Pallas port of models/TransT/loss/single_scale_feature_map.py (forward only)."""

    def __init__(self, loss_target_dict, weight_dict):
        self.loss_target_dict = loss_target_dict
        self.weight_dict = weight_dict

    def __call__(self, predicted, label):
        cls_logits, bbox_pred = predicted
        cls_label, bbox_target = label
        loss_dict = _feature_map_losses(cls_logits, cls_label, bbox_pred, bbox_target)
        losses = sum(loss_dict[k] * self.weight_dict[k] for k in loss_dict.keys())
        return (losses, *do_statistic(loss_dict, self.weight_dict))


def _reference_losses(cls_logits, cls_label, bbox_pred, bbox_target):
    # pure-JAX reference for correctness check
    N, _, H, W = cls_logits.shape
    L = N * H * W
    logits = jnp.transpose(cls_logits, (1, 0, 2, 3)).reshape(2, L)
    lab = cls_label.reshape(L)
    bp = jnp.transpose(bbox_pred, (1, 0, 2, 3)).reshape(4, L)
    bt = jnp.transpose(bbox_target, (1, 0, 2, 3)).reshape(4, L)
    pos = (lab > 0.5).astype(jnp.float32)
    lse = jax.scipy.special.logsumexp(logits, axis=0)
    sel = jnp.where(pos > 0.5, logits[1], logits[0])
    ce = jnp.mean(lse - sel)
    num_pos = jnp.maximum(jnp.sum(pos), 1.0)
    l1 = jnp.sum(jnp.sum(jnp.abs(bp - bt), axis=0) * pos) / num_pos

    def xyxy(b):
        return b[0] - b[2] / 2, b[1] - b[3] / 2, b[0] + b[2] / 2, b[1] + b[3] / 2

    px1, py1, px2, py2 = xyxy(bp)
    tx1, ty1, tx2, ty2 = xyxy(bt)
    inter = jnp.maximum(jnp.minimum(px2, tx2) - jnp.maximum(px1, tx1), 0.0) * \
            jnp.maximum(jnp.minimum(py2, ty2) - jnp.maximum(py1, ty1), 0.0)
    union = (px2 - px1) * (py2 - py1) + (tx2 - tx1) * (ty2 - ty1) - inter
    iou = inter / (union + 1e-7)
    enc = (jnp.maximum(px2, tx2) - jnp.minimum(px1, tx1)) * \
          (jnp.maximum(py2, ty2) - jnp.minimum(py1, ty1))
    giou = iou - (enc - union) / (enc + 1e-7)
    gl = jnp.sum((1.0 - giou) * pos) / num_pos
    return {"loss_ce": ce, "loss_bbox": l1, "loss_giou": gl}


if __name__ == "__main__":
    import numpy as np

    key = jax.random.PRNGKey(0)
    k1, k2, k3, k4 = jax.random.split(key, 4)

    N, H, W = 2, 16, 16   # small demo shape; spatial axis is padded+masked to a full (8,128) slab

    cls_logits = jax.random.normal(k1, (N, 2, H, W), dtype=jnp.float32)
    cls_label = (jax.random.uniform(k2, (N, H, W)) < 0.15).astype(jnp.float32)
    # boxes: centers in (0.2,0.8), widths/heights in (0.05, 0.35)
    bbox_pred = jnp.concatenate(
        [jax.random.uniform(k3, (N, 2, H, W), minval=0.2, maxval=0.8),
         jax.random.uniform(k3, (N, 2, H, W), minval=0.05, maxval=0.35)], axis=1)
    bbox_target = jnp.concatenate(
        [jax.random.uniform(k4, (N, 2, H, W), minval=0.2, maxval=0.8),
         jax.random.uniform(k4, (N, 2, H, W), minval=0.05, maxval=0.35)], axis=1)

    weight_dict = {"loss_ce": 8.334, "loss_bbox": 5.0, "loss_giou": 2.0}
    loss_target_dict = {"loss_ce": "class_label", "loss_bbox": "bbox_label", "loss_giou": "bbox_label"}

    criterion = SingleScaleFeatureMapCriterion(loss_target_dict, weight_dict)
    losses, weighted_stats, unweighted_stats = criterion(
        (cls_logits, bbox_pred), (cls_label, bbox_target))

    # block on everything
    jax.tree_util.tree_map(lambda x: x.block_until_ready(),
                           (losses, weighted_stats, unweighted_stats))

    # correctness check vs pure-JAX reference
    ref = _reference_losses(cls_logits, cls_label, bbox_pred, bbox_target)
    ref_total = sum(ref[k] * weight_dict[k] for k in ref)
    np.testing.assert_allclose(np.asarray(losses), np.asarray(ref_total), rtol=1e-5, atol=1e-5)
    for k in ref:
        np.testing.assert_allclose(np.asarray(unweighted_stats[k]), np.asarray(ref[k]),
                                   rtol=1e-5, atol=1e-5)

    print("KERNEL_OK")
</pallas_src>

<mosaic_0001>
module attributes {stable_mosaic.version = 11 : i64} {
  func.func @kernel(%arg0: i32, %arg1: i32, %arg2: memref<2x2x1x8x128xf32, #tpu.memory_space<vmem>>, %arg3: memref<2x1x8x128xf32, #tpu.memory_space<vmem>>, %arg4: memref<2x4x1x8x128xf32, #tpu.memory_space<vmem>>, %arg5: memref<2x4x1x8x128xf32, #tpu.memory_space<vmem>>, %arg6: memref<1x4x8x128xf32, #tpu.memory_space<vmem>>) attributes {dimension_semantics = [#tpu.dimension_semantics<parallel>, #tpu.dimension_semantics<arbitrary>], iteration_bounds = array<i64: 1, 1>, scalar_prefetch = 0 : i64, scratch_operands = 0 : i64, tpu.core_type = #tpu.core_type<tc>, window_params = [{transform_indices = @transform_0, window_bounds = array<i64: 2, 2, 1, 8, 128>}, {transform_indices = @transform_1, window_bounds = array<i64: 2, 1, 8, 128>}, {transform_indices = @transform_2, window_bounds = array<i64: 2, 4, 1, 8, 128>}, {transform_indices = @transform_3, window_bounds = array<i64: 2, 4, 1, 8, 128>}, {transform_indices = @transform_4, window_bounds = array<i64: 1, 4, 8, 128>}]} {
    %c0_i32 = arith.constant 0 : i32
    %0 = arith.cmpi eq, %arg1, %c0_i32 : i32
    %1 = arith.extui %0 : i1 to i32
    %c0_i32_0 = arith.constant 0 : i32
    %2 = arith.cmpi ne, %1, %c0_i32_0 : i32
    scf.if %2 {
      %cst_73 = arith.constant 0.000000e+00 : f32
      %183 = vector.broadcast %cst_73 : f32 to vector<1x4x8x128xf32>
      %c0_74 = arith.constant 0 : index
      %c0_75 = arith.constant 0 : index
      %c0_76 = arith.constant 0 : index
      %c0_77 = arith.constant 0 : index
      %184 = vector.load %arg6[%c0_74, %c0_75, %c0_76, %c0_77] : memref<1x4x8x128xf32, #tpu.memory_space<vmem>>, vector<1x4x8x128xf32>
      tpu.vector_store %arg6[%c0_74, %c0_75, %c0_76, %c0_77], %183 {strides = array<i32>} : memref<1x4x8x128xf32, #tpu.memory_space<vmem>>, vector<1x4x8x128xf32>,
    } else {
    }
    %c0 = arith.constant 0 : index
    %c0_1 = arith.constant 0 : index
    %c0_2 = arith.constant 0 : index
    %c0_3 = arith.constant 0 : index
    %c0_4 = arith.constant 0 : index
    %3 = vector.load %arg2[%c0, %c0_1, %c0_2, %c0_3, %c0_4] : memref<2x2x1x8x128xf32, #tpu.memory_space<vmem>>, vector<2x2x1x8x128xf32>
    %c0_5 = arith.constant 0 : index
    %c0_6 = arith.constant 0 : index
    %c0_7 = arith.constant 0 : index
    %c0_8 = arith.constant 0 : index
    %4 = vector.load %arg3[%c0_5, %c0_6, %c0_7, %c0_8] : memref<2x1x8x128xf32, #tpu.memory_space<vmem>>, vector<2x1x8x128xf32>
    %c0_9 = arith.constant 0 : index
    %c0_10 = arith.constant 0 : index
    %c0_11 = arith.constant 0 : index
    %c0_12 = arith.constant 0 : index
    %c0_13 = arith.constant 0 : index
    %5 = vector.load %arg4[%c0_9, %c0_10, %c0_11, %c0_12, %c0_13] : memref<2x4x1x8x128xf32, #tpu.memory_space<vmem>>, vector<2x4x1x8x128xf32>
    %c0_14 = arith.constant 0 : index
    %c0_15 = arith.constant 0 : index
    %c0_16 = arith.constant 0 : index
    %c0_17 = arith.constant 0 : index
    %c0_18 = arith.constant 0 : index
    %6 = vector.load %arg5[%c0_14, %c0_15, %c0_16, %c0_17, %c0_18] : memref<2x4x1x8x128xf32, #tpu.memory_space<vmem>>, vector<2x4x1x8x128xf32>
    %cst = arith.constant 5.000000e-01 : f32
    %7 = vector.broadcast %cst : f32 to vector<2x1x8x128xf32>
    %8 = arith.cmpf ogt, %4, %7 : vector<2x1x8x128xf32>
    %9 = arith.extui %8 : vector<2x1x8x128xi1> to vector<2x1x8x128xi32>
    %10 = arith.sitofp %9 : vector<2x1x8x128xi32> to vector<2x1x8x128xf32>
    %11 = vector.extract_strided_slice %3 {offsets = [0, 0, 0, 0, 0], sizes = [2, 1, 1, 8, 128], strides = [1, 1, 1, 1, 1]} : vector<2x2x1x8x128xf32> to vector<2x1x1x8x128xf32>
    %12 = vector.shape_cast %11 : vector<2x1x1x8x128xf32> to vector<2x1x8x128xf32>
    %13 = vector.extract_strided_slice %3 {offsets = [0, 1, 0, 0, 0], sizes = [2, 1, 1, 8, 128], strides = [1, 1, 1, 1, 1]} : vector<2x2x1x8x128xf32> to vector<2x1x1x8x128xf32>
    %14 = vector.shape_cast %13 : vector<2x1x1x8x128xf32> to vector<2x1x8x128xf32>
    %15 = arith.subf %12, %14 : vector<2x1x8x128xf32>
    %16 = arith.subf %14, %12 : vector<2x1x8x128xf32>
    %17 = arith.select %8, %15, %16 : vector<2x1x8x128xi1>, vector<2x1x8x128xf32>
    %cst_19 = arith.constant 0.000000e+00 : f32
    %18 = vector.broadcast %cst_19 : f32 to vector<2x1x8x128xf32>
    %19 = arith.maximumf %17, %18 : vector<2x1x8x128xf32>
    %20 = math.absf %17 : vector<2x1x8x128xf32>
    %cst_20 = arith.constant 0.000000e+00 : f32
    %21 = vector.broadcast %cst_20 : f32 to vector<2x1x8x128xf32>
    %22 = arith.subf %21, %20 : vector<2x1x8x128xf32>
    %23 = math.exp %22 : vector<2x1x8x128xf32>
    %cst_21 = arith.constant 1.000000e+00 : f32
    %24 = vector.broadcast %cst_21 : f32 to vector<2x1x8x128xf32>
    %25 = arith.addf %24, %23 : vector<2x1x8x128xf32>
    %26 = math.log %25 : vector<2x1x8x128xf32>
    %27 = arith.addf %19, %26 : vector<2x1x8x128xf32>
    %c1_i32 = arith.constant 1 : i32
    %28 = arith.muli %arg0, %c1_i32 : i32
    %29 = arith.addi %28, %arg1 : i32
    %c1024_i32 = arith.constant 1024 : i32
    %30 = arith.muli %29, %c1024_i32 : i32
    %31 = tpu.iota {dimensions = array<i32: 0>} : vector<1x8x128xi32>
    %c1024_i32_22 = arith.constant 1024 : i32
    %32 = vector.broadcast %c1024_i32_22 : i32 to vector<1x8x128xi32>
    %33 = arith.muli %31, %32 : vector<1x8x128xi32>
    %34 = tpu.iota {dimensions = array<i32: 1>} : vector<1x8x128xi32>
    %c128_i32 = arith.constant 128 : i32
    %35 = vector.broadcast %c128_i32 : i32 to vector<1x8x128xi32>
    %36 = arith.muli %34, %35 : vector<1x8x128xi32>
    %37 = arith.addi %33, %36 : vector<1x8x128xi32>
    %38 = tpu.iota {dimensions = array<i32: 2>} : vector<1x8x128xi32>
    %39 = arith.addi %37, %38 : vector<1x8x128xi32>
    %40 = vector.broadcast %30 : i32 to vector<1x8x128xi32>
    %41 = arith.addi %40, %39 : vector<1x8x128xi32>
    %c256_i32 = arith.constant 256 : i32
    %42 = vector.broadcast %c256_i32 : i32 to vector<1x8x128xi32>
    %43 = arith.cmpi slt, %41, %42 : vector<1x8x128xi32>
    %44 = arith.extui %43 : vector<1x8x128xi1> to vector<1x8x128xi32>
    %45 = arith.sitofp %44 : vector<1x8x128xi32> to vector<1x8x128xf32>
    %46 = vector.shape_cast %45 : vector<1x8x128xf32> to vector<1x1x8x128xf32>
    %47 = vector.broadcast %46 : vector<1x1x8x128xf32> to vector<2x1x8x128xf32>
    %48 = arith.mulf %27, %47 : vector<2x1x8x128xf32>
    %49 = arith.subf %5, %6 : vector<2x4x1x8x128xf32>
    %50 = math.absf %49 : vector<2x4x1x8x128xf32>
    %cst_23 = arith.constant dense<0.000000e+00> : vector<2x1x8x128xf32>
    %51 = vector.multi_reduction <add>, %50, %cst_23 [1] : vector<2x4x1x8x128xf32> to vector<2x1x8x128xf32>
    %52 = arith.mulf %51, %10 : vector<2x1x8x128xf32>
    %53 = vector.extract_strided_slice %5 {offsets = [0, 0, 0, 0, 0], sizes = [2, 1, 1, 8, 128], strides = [1, 1, 1, 1, 1]} : vector<2x4x1x8x128xf32> to vector<2x1x1x8x128xf32>
    %54 = vector.shape_cast %53 : vector<2x1x1x8x128xf32> to vector<2x1x8x128xf32>
    %55 = vector.extract_strided_slice %5 {offsets = [0, 2, 0, 0, 0], sizes = [2, 1, 1, 8, 128], strides = [1, 1, 1, 1, 1]} : vector<2x4x1x8x128xf32> to vector<2x1x1x8x128xf32>
    %56 = vector.shape_cast %55 : vector<2x1x1x8x128xf32> to vector<2x1x8x128xf32>
    %cst_24 = arith.constant 5.000000e-01 : f32
    %57 = vector.broadcast %cst_24 : f32 to vector<2x1x8x128xf32>
    %58 = arith.mulf %56, %57 : vector<2x1x8x128xf32>
    %59 = arith.subf %54, %58 : vector<2x1x8x128xf32>
    %60 = vector.extract_strided_slice %5 {offsets = [0, 0, 0, 0, 0], sizes = [2, 1, 1, 8, 128], strides = [1, 1, 1, 1, 1]} : vector<2x4x1x8x128xf32> to vector<2x1x1x8x128xf32>
    %61 = vector.shape_cast %60 : vector<2x1x1x8x128xf32> to vector<2x1x8x128xf32>
    %62 = vector.extract_strided_slice %5 {offsets = [0, 2, 0, 0, 0], sizes = [2, 1, 1, 8, 128], strides = [1, 1, 1, 1, 1]} : vector<2x4x1x8x128xf32> to vector<2x1x1x8x128xf32>
    %63 = vector.shape_cast %62 : vector<2x1x1x8x128xf32> to vector<2x1x8x128xf32>
    %cst_25 = arith.constant 5.000000e-01 : f32
    %64 = vector.broadcast %cst_25 : f32 to vector<2x1x8x128xf32>
    %65 = arith.mulf %63, %64 : vector<2x1x8x128xf32>
    %66 = arith.addf %61, %65 : vector<2x1x8x128xf32>
    %67 = vector.extract_strided_slice %5 {offsets = [0, 1, 0, 0, 0], sizes = [2, 1, 1, 8, 128], strides = [1, 1, 1, 1, 1]} : vector<2x4x1x8x128xf32> to vector<2x1x1x8x128xf32>
    %68 = vector.shape_cast %67 : vector<2x1x1x8x128xf32> to vector<2x1x8x128xf32>
    %69 = vector.extract_strided_slice %5 {offsets = [0, 3, 0, 0, 0], sizes = [2, 1, 1, 8, 128], strides = [1, 1, 1, 1, 1]} : vector<2x4x1x8x128xf32> to vector<2x1x1x8x128xf32>
    %70 = vector.shape_cast %69 : vector<2x1x1x8x128xf32> to vector<2x1x8x128xf32>
    %cst_26 = arith.constant 5.000000e-01 : f32
    %71 = vector.broadcast %cst_26 : f32 to vector<2x1x8x128xf32>
    %72 = arith.mulf %70, %71 : vector<2x1x8x128xf32>
    %73 = arith.subf %68, %72 : vector<2x1x8x128xf32>
    %74 = vector.extract_strided_slice %5 {offsets = [0, 1, 0, 0, 0], sizes = [2, 1, 1, 8, 128], strides = [1, 1, 1, 1, 1]} : vector<2x4x1x8x128xf32> to vector<2x1x1x8x128xf32>
    %75 = vector.shape_cast %74 : vector<2x1x1x8x128xf32> to vector<2x1x8x128xf32>
    %76 = vector.extract_strided_slice %5 {offsets = [0, 3, 0, 0, 0], sizes = [2, 1, 1, 8, 128], strides = [1, 1, 1, 1, 1]} : vector<2x4x1x8x128xf32> to vector<2x1x1x8x128xf32>
    %77 = vector.shape_cast %76 : vector<2x1x1x8x128xf32> to vector<2x1x8x128xf32>
    %cst_27 = arith.constant 5.000000e-01 : f32
    %78 = vector.broadcast %cst_27 : f32 to vector<2x1x8x128xf32>
    %79 = arith.mulf %77, %78 : vector<2x1x8x128xf32>
    %80 = arith.addf %75, %79 : vector<2x1x8x128xf32>
    %81 = vector.extract_strided_slice %6 {offsets = [0, 0, 0, 0, 0], sizes = [2, 1, 1, 8, 128], strides = [1, 1, 1, 1, 1]} : vector<2x4x1x8x128xf32> to vector<2x1x1x8x128xf32>
    %82 = vector.shape_cast %81 : vector<2x1x1x8x128xf32> to vector<2x1x8x128xf32>
    %83 = vector.extract_strided_slice %6 {offsets = [0, 2, 0, 0, 0], sizes = [2, 1, 1, 8, 128], strides = [1, 1, 1, 1, 1]} : vector<2x4x1x8x128xf32> to vector<2x1x1x8x128xf32>
    %84 = vector.shape_cast %83 : vector<2x1x1x8x128xf32> to vector<2x1x8x128xf32>
    %cst_28 = arith.constant 5.000000e-01 : f32
    %85 = vector.broadcast %cst_28 : f32 to vector<2x1x8x128xf32>
    %86 = arith.mulf %84, %85 : vector<2x1x8x128xf32>
    %87 = arith.subf %82, %86 : vector<2x1x8x128xf32>
    %88 = vector.extract_strided_slice %6 {offsets = [0, 0, 0, 0, 0], sizes = [2, 1, 1, 8, 128], strides = [1, 1, 1, 1, 1]} : vector<2x4x1x8x128xf32> to vector<2x1x1x8x128xf32>
    %89 = vector.shape_cast %88 : vector<2x1x1x8x128xf32> to vector<2x1x8x128xf32>
    %90 = vector.extract_strided_slice %6 {offsets = [0, 2, 0, 0, 0], sizes = [2, 1, 1, 8, 128], strides = [1, 1, 1, 1, 1]} : vector<2x4x1x8x128xf32> to vector<2x1x1x8x128xf32>
    %91 = vector.shape_cast %90 : vector<2x1x1x8x128xf32> to vector<2x1x8x128xf32>
    %cst_29 = arith.constant 5.000000e-01 : f32
    %92 = vector.broadcast %cst_29 : f32 to vector<2x1x8x128xf32>
    %93 = arith.mulf %91, %92 : vector<2x1x8x128xf32>
    %94 = arith.addf %89, %93 : vector<2x1x8x128xf32>
    %95 = vector.extract_strided_slice %6 {offsets = [0, 1, 0, 0, 0], sizes = [2, 1, 1, 8, 128], strides = [1, 1, 1, 1, 1]} : vector<2x4x1x8x128xf32> to vector<2x1x1x8x128xf32>
    %96 = vector.shape_cast %95 : vector<2x1x1x8x128xf32> to vector<2x1x8x128xf32>
    %97 = vector.extract_strided_slice %6 {offsets = [0, 3, 0, 0, 0], sizes = [2, 1, 1, 8, 128], strides = [1, 1, 1, 1, 1]} : vector<2x4x1x8x128xf32> to vector<2x1x1x8x128xf32>
    %98 = vector.shape_cast %97 : vector<2x1x1x8x128xf32> to vector<2x1x8x128xf32>
    %cst_30 = arith.constant 5.000000e-01 : f32
    %99 = vector.broadcast %cst_30 : f32 to vector<2x1x8x128xf32>
    %100 = arith.mulf %98, %99 : vector<2x1x8x128xf32>
    %101 = arith.subf %96, %100 : vector<2x1x8x128xf32>
    %102 = vector.extract_strided_slice %6 {offsets = [0, 1, 0, 0, 0], sizes = [2, 1, 1, 8, 128], strides = [1, 1, 1, 1, 1]} : vector<2x4x1x8x128xf32> to vector<2x1x1x8x128xf32>
    %103 = vector.shape_cast %102 : vector<2x1x1x8x128xf32> to vector<2x1x8x128xf32>
    %104 = vector.extract_strided_slice %6 {offsets = [0, 3, 0, 0, 0], sizes = [2, 1, 1, 8, 128], strides = [1, 1, 1, 1, 1]} : vector<2x4x1x8x128xf32> to vector<2x1x1x8x128xf32>
    %105 = vector.shape_cast %104 : vector<2x1x1x8x128xf32> to vector<2x1x8x128xf32>
    %cst_31 = arith.constant 5.000000e-01 : f32
    %106 = vector.broadcast %cst_31 : f32 to vector<2x1x8x128xf32>
    %107 = arith.mulf %105, %106 : vector<2x1x8x128xf32>
    %108 = arith.addf %103, %107 : vector<2x1x8x128xf32>
    %109 = arith.subf %66, %59 : vector<2x1x8x128xf32>
    %110 = arith.subf %80, %73 : vector<2x1x8x128xf32>
    %111 = arith.mulf %109, %110 : vector<2x1x8x128xf32>
    %112 = arith.subf %94, %87 : vector<2x1x8x128xf32>
    %113 = arith.subf %108, %101 : vector<2x1x8x128xf32>
    %114 = arith.mulf %112, %113 : vector<2x1x8x128xf32>
    %115 = arith.minimumf %66, %94 : vector<2x1x8x128xf32>
    %116 = arith.maximumf %59, %87 : vector<2x1x8x128xf32>
    %117 = arith.subf %115, %116 : vector<2x1x8x128xf32>
    %cst_32 = arith.constant 0.000000e+00 : f32
    %118 = vector.broadcast %cst_32 : f32 to vector<2x1x8x128xf32>
    %119 = arith.maximumf %117, %118 : vector<2x1x8x128xf32>
    %120 = arith.minimumf %80, %108 : vector<2x1x8x128xf32>
    %121 = arith.maximumf %73, %101 : vector<2x1x8x128xf32>
    %122 = arith.subf %120, %121 : vector<2x1x8x128xf32>
    %cst_33 = arith.constant 0.000000e+00 : f32
    %123 = vector.broadcast %cst_33 : f32 to vector<2x1x8x128xf32>
    %124 = arith.maximumf %122, %123 : vector<2x1x8x128xf32>
    %125 = arith.mulf %119, %124 : vector<2x1x8x128xf32>
    %126 = arith.addf %111, %114 : vector<2x1x8x128xf32>
    %127 = arith.subf %126, %125 : vector<2x1x8x128xf32>
    %cst_34 = arith.constant 1.000000e-07 : f32
    %128 = vector.broadcast %cst_34 : f32 to vector<2x1x8x128xf32>
    %129 = arith.addf %127, %128 : vector<2x1x8x128xf32>
    %cst_35 = arith.constant 1.000000e+00 : f32
    %130 = vector.broadcast %cst_35 : f32 to vector<2x1x8x128xf32>
    %131 = arith.select %8, %129, %130 : vector<2x1x8x128xi1>, vector<2x1x8x128xf32>
    %132 = arith.divf %125, %131 : vector<2x1x8x128xf32>
    %133 = arith.maximumf %66, %94 : vector<2x1x8x128xf32>
    %134 = arith.minimumf %59, %87 : vector<2x1x8x128xf32>
    %135 = arith.subf %133, %134 : vector<2x1x8x128xf32>
    %136 = arith.maximumf %80, %108 : vector<2x1x8x128xf32>
    %137 = arith.minimumf %73, %101 : vector<2x1x8x128xf32>
    %138 = arith.subf %136, %137 : vector<2x1x8x128xf32>
    %139 = arith.mulf %135, %138 : vector<2x1x8x128xf32>
    %140 = arith.subf %139, %127 : vector<2x1x8x128xf32>
    %cst_36 = arith.constant 1.000000e-07 : f32
    %141 = vector.broadcast %cst_36 : f32 to vector<2x1x8x128xf32>
    %142 = arith.addf %139, %141 : vector<2x1x8x128xf32>
    %cst_37 = arith.constant 1.000000e+00 : f32
    %143 = vector.broadcast %cst_37 : f32 to vector<2x1x8x128xf32>
    %144 = arith.select %8, %142, %143 : vector<2x1x8x128xi1>, vector<2x1x8x128xf32>
    %145 = arith.divf %140, %144 : vector<2x1x8x128xf32>
    %146 = arith.subf %132, %145 : vector<2x1x8x128xf32>
    %cst_38 = arith.constant 1.000000e+00 : f32
    %147 = vector.broadcast %cst_38 : f32 to vector<2x1x8x128xf32>
    %148 = arith.subf %147, %146 : vector<2x1x8x128xf32>
    %cst_39 = arith.constant 0.000000e+00 : f32
    %149 = vector.broadcast %cst_39 : f32 to vector<2x1x8x128xf32>
    %150 = arith.select %8, %148, %149 : vector<2x1x8x128xi1>, vector<2x1x8x128xf32>
    %c0_40 = arith.constant 0 : index
    %c0_41 = arith.constant 0 : index
    %c0_42 = arith.constant 0 : index
    %c0_43 = arith.constant 0 : index
    %151 = vector.load %arg6[%c0_40, %c0_41, %c0_42, %c0_43] : memref<1x4x8x128xf32, #tpu.memory_space<vmem>>, vector<1x1x8x128xf32>
    %152 = vector.shape_cast %151 : vector<1x1x8x128xf32> to vector<8x128xf32>
    %153 = vector.shape_cast %48 : vector<2x1x8x128xf32> to vector<2x8x128xf32>
    %cst_44 = arith.constant dense<0.000000e+00> : vector<8x128xf32>
    %154 = vector.multi_reduction <add>, %153, %cst_44 [0] : vector<2x8x128xf32> to vector<8x128xf32>
    %155 = arith.addf %152, %154 : vector<8x128xf32>
    %c0_45 = arith.constant 0 : index
    %c0_46 = arith.constant 0 : index
    %c0_47 = arith.constant 0 : index
    %c0_48 = arith.constant 0 : index
    %156 = vector.load %arg6[%c0_45, %c0_46, %c0_47, %c0_48] : memref<1x4x8x128xf32, #tpu.memory_space<vmem>>, vector<1x1x8x128xf32>
    %157 = vector.shape_cast %156 : vector<1x1x8x128xf32> to vector<8x128xf32>
    %158 = vector.shape_cast %155 : vector<8x128xf32> to vector<1x1x8x128xf32>
    tpu.vector_store %arg6[%c0_45, %c0_46, %c0_47, %c0_48], %158 {strides = array<i32>} : memref<1x4x8x128xf32, #tpu.memory_space<vmem>>, vector<1x1x8x128xf32>,
    %c0_49 = arith.constant 0 : index
    %c1 = arith.constant 1 : index
    %c0_50 = arith.constant 0 : index
    %c0_51 = arith.constant 0 : index
    %159 = vector.load %arg6[%c0_49, %c1, %c0_50, %c0_51] : memref<1x4x8x128xf32, #tpu.memory_space<vmem>>, vector<1x1x8x128xf32>
    %160 = vector.shape_cast %159 : vector<1x1x8x128xf32> to vector<8x128xf32>
    %161 = vector.shape_cast %52 : vector<2x1x8x128xf32> to vector<2x8x128xf32>
    %cst_52 = arith.constant dense<0.000000e+00> : vector<8x128xf32>
    %162 = vector.multi_reduction <add>, %161, %cst_52 [0] : vector<2x8x128xf32> to vector<8x128xf32>
    %163 = arith.addf %160, %162 : vector<8x128xf32>
    %c0_53 = arith.constant 0 : index
    %c1_54 = arith.constant 1 : index
    %c0_55 = arith.constant 0 : index
    %c0_56 = arith.constant 0 : index
    %164 = vector.load %arg6[%c0_53, %c1_54, %c0_55, %c0_56] : memref<1x4x8x128xf32, #tpu.memory_space<vmem>>, vector<1x1x8x128xf32>
    %165 = vector.shape_cast %164 : vector<1x1x8x128xf32> to vector<8x128xf32>
    %166 = vector.shape_cast %163 : vector<8x128xf32> to vector<1x1x8x128xf32>
    tpu.vector_store %arg6[%c0_53, %c1_54, %c0_55, %c0_56], %166 {strides = array<i32>} : memref<1x4x8x128xf32, #tpu.memory_space<vmem>>, vector<1x1x8x128xf32>,
    %c0_57 = arith.constant 0 : index
    %c2 = arith.constant 2 : index
    %c0_58 = arith.constant 0 : index
    %c0_59 = arith.constant 0 : index
    %167 = vector.load %arg6[%c0_57, %c2, %c0_58, %c0_59] : memref<1x4x8x128xf32, #tpu.memory_space<vmem>>, vector<1x1x8x128xf32>
    %168 = vector.shape_cast %167 : vector<1x1x8x128xf32> to vector<8x128xf32>
    %169 = vector.shape_cast %150 : vector<2x1x8x128xf32> to vector<2x8x128xf32>
    %cst_60 = arith.constant dense<0.000000e+00> : vector<8x128xf32>
    %170 = vector.multi_reduction <add>, %169, %cst_60 [0] : vector<2x8x128xf32> to vector<8x128xf32>
    %171 = arith.addf %168, %170 : vector<8x128xf32>
    %c0_61 = arith.constant 0 : index
    %c2_62 = arith.constant 2 : index
    %c0_63 = arith.constant 0 : index
    %c0_64 = arith.constant 0 : index
    %172 = vector.load %arg6[%c0_61, %c2_62, %c0_63, %c0_64] : memref<1x4x8x128xf32, #tpu.memory_space<vmem>>, vector<1x1x8x128xf32>
    %173 = vector.shape_cast %172 : vector<1x1x8x128xf32> to vector<8x128xf32>
    %174 = vector.shape_cast %171 : vector<8x128xf32> to vector<1x1x8x128xf32>
    tpu.vector_store %arg6[%c0_61, %c2_62, %c0_63, %c0_64], %174 {strides = array<i32>} : memref<1x4x8x128xf32, #tpu.memory_space<vmem>>, vector<1x1x8x128xf32>,
    %c0_65 = arith.constant 0 : index
    %c3 = arith.constant 3 : index
    %c0_66 = arith.constant 0 : index
    %c0_67 = arith.constant 0 : index
    %175 = vector.load %arg6[%c0_65, %c3, %c0_66, %c0_67] : memref<1x4x8x128xf32, #tpu.memory_space<vmem>>, vector<1x1x8x128xf32>
    %176 = vector.shape_cast %175 : vector<1x1x8x128xf32> to vector<8x128xf32>
    %177 = vector.shape_cast %10 : vector<2x1x8x128xf32> to vector<2x8x128xf32>
    %cst_68 = arith.constant dense<0.000000e+00> : vector<8x128xf32>
    %178 = vector.multi_reduction <add>, %177, %cst_68 [0] : vector<2x8x128xf32> to vector<8x128xf32>
    %179 = arith.addf %176, %178 : vector<8x128xf32>
    %c0_69 = arith.constant 0 : index
    %c3_70 = arith.constant 3 : index
    %c0_71 = arith.constant 0 : index
    %c0_72 = arith.constant 0 : index
    %180 = vector.load %arg6[%c0_69, %c3_70, %c0_71, %c0_72] : memref<1x4x8x128xf32, #tpu.memory_space<vmem>>, vector<1x1x8x128xf32>
    %181 = vector.shape_cast %180 : vector<1x1x8x128xf32> to vector<8x128xf32>
    %182 = vector.shape_cast %179 : vector<8x128xf32> to vector<1x1x8x128xf32>
    tpu.vector_store %arg6[%c0_69, %c3_70, %c0_71, %c0_72], %182 {strides = array<i32>} : memref<1x4x8x128xf32, #tpu.memory_space<vmem>>, vector<1x1x8x128xf32>,
    return
  }
  func.func @transform_0(%arg0: i32, %arg1: i32) -> (i32, i32, i32, i32, i32) {
    %c1_i32 = arith.constant 1 : i32
    %0 = arith.muli %arg0, %c1_i32 : i32
    %1 = arith.addi %0, %arg1 : i32
    %c0_i32 = arith.constant 0 : i32
    %c0_i32_0 = arith.constant 0 : i32
    %c0_i32_1 = arith.constant 0 : i32
    %c0_i32_2 = arith.constant 0 : i32
    %c0_i32_3 = arith.constant 0 : i32
    return %c0_i32, %c0_i32_0, %1, %c0_i32_1, %c0_i32_2 : i32, i32, i32, i32, i32
  }
  func.func @transform_1(%arg0: i32, %arg1: i32) -> (i32, i32, i32, i32) {
    %c1_i32 = arith.constant 1 : i32
    %0 = arith.muli %arg0, %c1_i32 : i32
    %1 = arith.addi %0, %arg1 : i32
    %c0_i32 = arith.constant 0 : i32
    %c0_i32_0 = arith.constant 0 : i32
    %c0_i32_1 = arith.constant 0 : i32
    %c0_i32_2 = arith.constant 0 : i32
    return %c0_i32, %1, %c0_i32_0, %c0_i32_1 : i32, i32, i32, i32
  }
  func.func @transform_2(%arg0: i32, %arg1: i32) -> (i32, i32, i32, i32, i32) {
    %c1_i32 = arith.constant 1 : i32
    %0 = arith.muli %arg0, %c1_i32 : i32
    %1 = arith.addi %0, %arg1 : i32
    %c0_i32 = arith.constant 0 : i32
    %c0_i32_0 = arith.constant 0 : i32
    %c0_i32_1 = arith.constant 0 : i32
    %c0_i32_2 = arith.constant 0 : i32
    %c0_i32_3 = arith.constant 0 : i32
    return %c0_i32, %c0_i32_0, %1, %c0_i32_1, %c0_i32_2 : i32, i32, i32, i32, i32
  }
  func.func @transform_3(%arg0: i32, %arg1: i32) -> (i32, i32, i32, i32, i32) {
    %c1_i32 = arith.constant 1 : i32
    %0 = arith.muli %arg0, %c1_i32 : i32
    %1 = arith.addi %0, %arg1 : i32
    %c0_i32 = arith.constant 0 : i32
    %c0_i32_0 = arith.constant 0 : i32
    %c0_i32_1 = arith.constant 0 : i32
    %c0_i32_2 = arith.constant 0 : i32
    %c0_i32_3 = arith.constant 0 : i32
    return %c0_i32, %c0_i32_0, %1, %c0_i32_1, %c0_i32_2 : i32, i32, i32, i32, i32
  }
  func.func @transform_4(%arg0: i32, %arg1: i32) -> (i32, i32, i32, i32) {
    %c0_i32 = arith.constant 0 : i32
    %c0_i32_0 = arith.constant 0 : i32
    %c0_i32_1 = arith.constant 0 : i32
    %c0_i32_2 = arith.constant 0 : i32
    return %arg0, %c0_i32, %c0_i32_0, %c0_i32_1 : i32, i32, i32, i32
  }
}

</mosaic_0001>

<bundles_post_ra>
// kernel: tpu_custom_call.1
= control target key start
LH: loop header
LB: loop body
LE: loop exit
PB: predicated region body
PF: predicated region fallthrough
CT: control target
= control target key end

     0   :  { %9 = vsyncpa [#allocation3], 0  ;;  %s767_s0 = inlined_call_operand.hbm [shape: f32[2,2,1,8,128], index: 0, kind: input, shape index: {}]   ;;  %s768_s1 = inlined_call_operand.hbm [shape: f32[2,1,8,128], index: 1, kind: input, shape index: {}]   ;;  %s769_s2 = inlined_call_operand.hbm [shape: f32[2,4,1,8,128], index: 2, kind: input, shape index: {}]   ;;  %s770_s3 = inlined_call_operand.hbm [shape: f32[2,4,1,8,128], index: 3, kind: input, shape index: {}]   ;;  %s771_s4 = inlined_call_operand.hbm [shape: f32[1,4,8,128], index: 4, kind: output, shape index: {}]  }
   0x1   :  { %10 = vsyncpa [#allocation6], 0 }
   0x2   :  { %11 = vsyncpa [#allocation9], 0 }
   0x3   :  { %12 = vsyncpa [#allocation4], 0  ;;  %s36_s17 = sshll.u32 %s768_s1, 4  ;;  %s539_s18 = smov [#allocation5]   ;;  %s37_s17 = int_to_ptr.hbm [resolvable:$true] %s36_s17 }
   0x4   :  { %s38_s19 = sshll.u32 %s539_s18, 4  ;;  %s20_s22 = sshll.u32 %s767_s0, 4  ;;  %s39_s19 = int_to_ptr.vmem [resolvable:$true] %s38_s19  ;;  %s21_s22 = int_to_ptr.hbm [resolvable:$true] %s20_s22 }
   0x5   :  { %s540_s23 = smov 128   ;;  %s541_s24 = smov 8  }
   0x6   :  { %44 = dma.hbm_to_vmem [thread:$0]  %s37_s17, 256, %s39_s19, [#allocation6], %s540_s23, %s540_s23, %s541_s24  }
   0x7   :  { %s542_s25 = smov [#allocation2]   ;;  %s52_s1 = sshll.u32 %s769_s2, 4  ;;  %s53_s1 = int_to_ptr.hbm [resolvable:$true] %s52_s1 }
   0x8   :  { %s22_s26 = sshll.u32 %s542_s25, 4  ;;  %s68_s30 = sshll.u32 %s770_s3, 4  ;;  %s23_s26 = int_to_ptr.vmem [resolvable:$true] %s22_s26  ;;  %s69_s30 = int_to_ptr.hbm [resolvable:$true] %s68_s30 }
   0x9   :  { %28 = dma.hbm_to_vmem [thread:$0]  %s21_s22, 512, %s23_s26, [#allocation3], %s540_s23, %s540_s23, %s541_s24  }
   0xa   :  { %s543_s5 = smov [#allocation7]   ;;  %s544_s7 = smov [#allocation8]  }
   0xb   :  { %s54_s6 = sshll.u32 %s543_s5, 4  ;;  %s70_s2 = sshll.u32 %s544_s7, 4  ;;  %s55_s6 = int_to_ptr.vmem [resolvable:$true] %s54_s6  ;;  %s71_s2 = int_to_ptr.vmem [resolvable:$true] %s70_s2 }
   0xc   :  { %60 = dma.hbm_to_vmem [thread:$0]  %s53_s1, 1024, %s55_s6, [#allocation6], %s540_s23, %s540_s23, %s541_s24  }
   0xd   :  { %76 = dma.hbm_to_vmem [thread:$0]  %s69_s30, 1024, %s71_s2, [#allocation9], %s540_s23, %s540_s23, %s541_s24  }
   0xe   :  { %531 = dma.done.wait [#allocation3], 512  }
   0xf   :  { %532 = vsyncadd [#allocation3], 4294966784 }
  0x10   :  { %533 = dma.done.wait [#allocation6], 1280  }
  0x11   :  { %534 = vsyncadd [#allocation6], 4294966016 }
  0x12   :  { %535 = dma.done.wait [#allocation9], 1024  }
  0x13   :  { %536 = vsyncadd [#allocation9], 4294966272  ;;  %v159_v0 = vlaneseq  ;;  %v105_v3 = vld [vmem:[#allocation2] sm:$0xff]  ;;  %v106_v4 = vld [vmem:[#allocation2 + $0x8] sm:$0xff]  ;;  %v545_v32 = vmov 0.0   ;;  %s546_s3 = smov [#allocation10]  }
  0x14   :  { %v107_v5 = vld [vmem:[#allocation2 + $0x10] sm:$0xff]  ;;  %v108_v6 = vld [vmem:[#allocation2 + $0x18] sm:$0xff]  ;;  %v596_v7 = vld [vmem:[#allocation5] sm:$0xff]  ;;  %v133_v9 = vsub.f32 %v105_v3, %v106_v4  ;;  %v135_v10 = vsub.f32 %v106_v4, %v105_v3  ;;  %s367_s8 = sshll.u32 %s546_s3, 4  ;;  %s369_s11 = sshll.u32 %s771_s4, 4  ;;  %s368_s8 = int_to_ptr.vmem [resolvable:$true] %s367_s8  ;;  %s370_s11 = int_to_ptr.hbm [resolvable:$true] %s369_s11 }
  0x15   :  { %v160_v1 = vshrl.u32 %v159_v0, 7  ;;  %v163_v2 = vand.u32 127, %v159_v0  ;;  %v598_v8 = vld [vmem:[#allocation5 + $0x8] sm:$0xff]  ;;  %vm127_vm0 = vcmp.gt.f32.partialorder %v596_v7, 0.5  ;;  %v134_v12 = vsub.f32 %v107_v5, %v108_v6  ;;  %v113_v14 = vld [vmem:[#allocation7 + $0x10] sm:$0xff]  ;;  %v111_v17 = vld [vmem:[#allocation7] sm:$0xff] }
  0x16   :  { %vm128_vm1 = vcmp.gt.f32.partialorder %v598_v8, 0.5  ;;  %v136_v13 = vsub.f32 %v108_v6, %v107_v5  ;;  %v604_v15 = vsel %vm127_vm0, %v133_v9, %v135_v10  ;;  %v112_v18 = vld [vmem:[#allocation7 + $0x8] sm:$0xff]  ;;  %v114_v22 = vld [vmem:[#allocation7 + $0x18] sm:$0xff]  ;;  %v612_v23 = vld [vmem:[#allocation8] sm:$0xff]  ;;  %v196_v24 = vmul.f32 0.5, %v113_v14 }
  0x17   :  { %v161_v11 = vmul.u32 128, %v160_v1  ;;  %v139_v20 = vmax.f32 %v604_v15, 0.0  ;;  %v141_v21 = vand.u32 2147483647, %v604_v15  ;;  %v115_v27 = vld [vmem:[#allocation7 + $0x20] sm:$0xff]  ;;  %v116_v28 = vld [vmem:[#allocation7 + $0x28] sm:$0xff]  ;;  %v172_v30 = vsub.f32 %v111_v17, %v612_v23 }
  0x18   :  { %v608_v19 = vsel %vm128_vm1, %v134_v12, %v136_v13  ;;  %v616_v29 = vld [vmem:[#allocation8 + $0x8] sm:$0xff]  ;;  %v117_v34 = vld [vmem:[#allocation7 + $0x30] sm:$0xff]  ;;  %v122_v36 = vld [vmem:[#allocation8 + $0x18] sm:$0xff]  ;;  %v623_v37 = vsel %vm127_vm0, 1.0, %v545_v32  ;;  %v628_v43 = vsel %vm128_vm1, 1.0, %v545_v32  ;;  %v630_v0 = vsub.f32 %v111_v17, %v196_v24 }
  0x19   :  { %v164_v16 = vadd.s32 %v163_v2, %v161_v11  ;;  %v140_v25 = vmax.f32 %v608_v19, 0.0  ;;  %v142_v26 = vand.u32 2147483647, %v608_v19  ;;  %v143_v31 = vsub.f32 0.0, %v141_v21  ;;  %v121_v35 = vld [vmem:[#allocation8 + $0x10] sm:$0xff]  ;;  %v123_v40 = vld [vmem:[#allocation8 + $0x20] sm:$0xff] }
  0x1a   :  { %v173_v38 = vsub.f32 %v112_v18, %v616_v29  ;;  %v124_v41 = vld [vmem:[#allocation8 + $0x28] sm:$0xff]  ;;  %v125_v42 = vld [vmem:[#allocation8 + $0x30] sm:$0xff]  ;;  %v174_v44 = vsub.f32 %v113_v14, %v121_v35  ;;  %v175_v45 = vsub.f32 %v114_v22, %v122_v36  ;;  %v118_v47 = vld [vmem:[#allocation7 + $0x38] sm:$0xff]  ;;  %v176_v49 = vsub.f32 %v115_v27, %v123_v40 }
  0x1b   :  { %vm167_vm2 = vcmp.lt.s32.totalorder %v164_v16, 256  ;;  %v144_v39 = vsub.f32 0.0, %v142_v26  ;;  %v145_v46 = vmul.f32 1.442695, %v143_v31  ;;  %v126_v48 = vld [vmem:[#allocation8 + $0x38] sm:$0xff]  ;;  %v177_v50 = vsub.f32 %v116_v28, %v124_v41 }
  0x1c   :  { %v619_v33 = vsel %vm167_vm2, 1.0, %v545_v32  ;;  %v178_v51 = vsub.f32 %v117_v34, %v125_v42  ;;  %v179_v53 = vsub.f32 %v118_v47, %v126_v48  ;;  %v180_v54 = vand.u32 2147483647, %v172_v30 }
  0x1d   :  { %v147_v52 = vmul.f32 1.442695, %v144_v39  ;;  %v181_v55 = vand.u32 2147483647, %v173_v38  ;;  %395 = vpow2.f32 %v145_v46  ;;  %v182_v56 = vand.u32 2147483647, %v174_v44 }
  0x1e   :  { %v183_v57 = vand.u32 2147483647, %v175_v45  ;;  %v184_v58 = vand.u32 2147483647, %v176_v49  ;;  %v185_v59 = vand.u32 2147483647, %v177_v50  ;;  %v632_v1 = vadd.f32 %v196_v24, %v111_v17 }
  0x1f   :  { %397 = vpow2.f32 %v147_v52  ;;  %v186_v60 = vand.u32 2147483647, %v178_v51  ;;  %v187_v61 = vand.u32 2147483647, %v179_v53  ;;  %v188_v62 = vadd.f32 %v181_v55, %v180_v54 }
  0x20   :  { %v197_v63 = vmul.f32 0.5, %v117_v34  ;;  %v191_v2 = vadd.f32 %v185_v59, %v184_v58  ;;  %v202_v3 = vmul.f32 0.5, %v114_v22  ;;  %v203_v4 = vmul.f32 0.5, %v118_v47 }
  0x21   :  { %v208_v5 = vmul.f32 0.5, %v121_v35  ;;  %v189_v6 = vadd.f32 %v188_v62, %v182_v56  ;;  %v209_v11 = vmul.f32 0.5, %v125_v42  ;;  %v214_v38 = vmul.f32 0.5, %v122_v36 }
  0x22   :  { %v634_v9 = vsub.f32 %v115_v27, %v197_v63  ;;  %v636_v10 = vadd.f32 %v197_v63, %v115_v27  ;;  %v192_v12 = vadd.f32 %v191_v2, %v186_v60  ;;  %v638_v13 = vsub.f32 %v112_v18, %v202_v3 }
  0x23   :  { %v640_v14 = vsub.f32 %v116_v28, %v203_v4  ;;  %v642_v16 = vadd.f32 %v202_v3, %v112_v18  ;;  %v396_v21 = vpop.eup %395  ;;  %v190_v17 = vadd.f32 %v189_v6, %v183_v57  ;;  %v644_v24 = vadd.f32 %v203_v4, %v116_v28 }
  0x24   :  { %v647_v22 = vsub.f32 %v612_v23, %v208_v5  ;;  %v649_v26 = vsub.f32 %v123_v40, %v209_v11  ;;  %v149_v27 = vadd.f32 1.0, %v396_v21  ;;  %v193_v31 = vadd.f32 %v192_v12, %v187_v61 }
  0x25   :  { %v398_v30 = vpop.eup %397  ;;  %v212_v32 = vadd.f32 %v208_v5, %v612_v23  ;;  %v652_v34 = vadd.f32 %v209_v11, %v123_v40  ;;  %v194_v18 = vmul.f32 %v623_v37, %v190_v17  ;;  %v215_v39 = vmul.f32 0.5, %v126_v48 }
  0x26   :  { %v150_v35 = vadd.f32 1.0, %v398_v30  ;;  %399 = vlog2.f32 %v149_v27  ;;  %v195_v28 = vmul.f32 %v628_v43, %v193_v31  ;;  %v222_v42 = vsub.f32 %v642_v16, %v638_v13 }
  0x27   :  { %v223_v44 = vsub.f32 %v644_v24, %v640_v14  ;;  %v216_v45 = vsub.f32 %v616_v29, %v214_v38  ;;  %v217_v23 = vsub.f32 %v124_v41, %v215_v39  ;;  %v218_v40 = vadd.f32 %v214_v38, %v616_v29 }
  0x28   :  { %401 = vlog2.f32 %v150_v35  ;;  %v219_v46 = vadd.f32 %v215_v39, %v124_v41  ;;  %v350_v47 = vadd.f32 %v195_v28, %v194_v18  ;;  %v220_v36 = vsub.f32 %v632_v1, %v630_v0 }
  0x29   :  { %v221_v48 = vsub.f32 %v636_v10, %v634_v9  ;;  %v228_v49 = vsub.f32 %v218_v40, %v216_v45  ;;  %v226_v50 = vsub.f32 %v212_v32, %v647_v22  ;;  %v227_v51 = vsub.f32 %v652_v34, %v649_v26 }
  0x2a   :  { %v232_v52 = vmin.f32 %v632_v1, %v212_v32  ;;  %v229_v53 = vsub.f32 %v219_v46, %v217_v23  ;;  %v224_v54 = vmul.f32 %v222_v42, %v220_v36  ;;  %v233_v41 = vmin.f32 %v636_v10, %v652_v34  ;;  %352 = vst [vmem:[#allocation10 + $0x8] sm:$0xff] %v350_v47 }
  0x2b   :  { %v225_v55 = vmul.f32 %v223_v44, %v221_v48  ;;  %v230_v29 = vmul.f32 %v228_v49, %v226_v50  ;;  %v234_v56 = vmax.f32 %v630_v0, %v647_v22  ;;  %v235_v57 = vmax.f32 %v634_v9, %v649_v26 }
  0x2c   :  { %v400_v58 = vpop.eup %399  ;;  %v231_v59 = vmul.f32 %v229_v53, %v227_v51  ;;  %v240_v60 = vmin.f32 %v642_v16, %v218_v40  ;;  %v241_v61 = vmin.f32 %v644_v24, %v219_v46  ;;  %v242_v62 = vmax.f32 %v638_v13, %v216_v45 }
  0x2d   :  { %v152_v2 = vmul.f32 0.6931472, %v400_v58  ;;  %v236_v3 = vsub.f32 %v232_v52, %v234_v56  ;;  %v237_v4 = vsub.f32 %v233_v41, %v235_v57  ;;  %v243_v5 = vmax.f32 %v640_v14, %v217_v23 }
  0x2e   :  { %v402_v63 = vpop.eup %401  ;;  %v244_v11 = vsub.f32 %v240_v60, %v242_v62  ;;  %v250_v12 = vadd.f32 %v230_v29, %v224_v54  ;;  %v251_v21 = vadd.f32 %v231_v59, %v225_v55  ;;  %v288_v38 = vmax.f32 %v632_v1, %v212_v32 }
  0x2f   :  { %v154_v6 = vmul.f32 0.6931472, %v402_v63  ;;  %v155_v17 = vadd.f32 %v152_v2, %v139_v20  ;;  %v238_v30 = vmax.f32 %v236_v3, 0.0  ;;  %v239_v27 = vmax.f32 %v237_v4, 0.0 }
  0x30   :  { %v245_v31 = vsub.f32 %v241_v61, %v243_v5  ;;  %v246_v18 = vmax.f32 %v244_v11, 0.0  ;;  %v289_v39 = vmax.f32 %v636_v10, %v652_v34  ;;  %v290_v44 = vmin.f32 %v630_v0, %v647_v22 }
  0x31   :  { %v156_v35 = vadd.f32 %v154_v6, %v140_v25  ;;  %v170_v28 = vmul.f32 %v619_v33, %v155_v17  ;;  %v291_v15 = vmin.f32 %v634_v9, %v649_v26  ;;  %v294_v19 = vmax.f32 %v642_v16, %v218_v40 }
  0x32   :  { %v247_v42 = vmax.f32 %v245_v31, 0.0  ;;  %v693_v47 = vmul.f32 %v246_v18, %v238_v30  ;;  %v295_v25 = vmax.f32 %v644_v24, %v219_v46  ;;  %v292_v10 = vsub.f32 %v288_v38, %v290_v44 }
  0x33   :  { %v171_v20 = vmul.f32 %v619_v33, %v156_v35  ;;  %v296_v32 = vmin.f32 %v638_v13, %v216_v45  ;;  %v293_v0 = vsub.f32 %v289_v39, %v291_v15  ;;  %v297_v9 = vmin.f32 %v640_v14, %v217_v23 }
  0x34   :  { %v697_v1 = vmul.f32 %v247_v42, %v239_v27  ;;  %v701_v36 = vsub.f32 %v250_v12, %v693_v47  ;;  %v360_v23 = vadd.f32 %v628_v43, %v623_v37 }
  0x35   :  { %v345_v34 = vadd.f32 %v171_v20, %v170_v28  ;;  %v298_v22 = vsub.f32 %v294_v19, %v296_v32  ;;  %v299_v26 = vsub.f32 %v295_v25, %v297_v9 }
  0x36   :  { %v705_v33 = vsub.f32 %v251_v21, %v697_v1  ;;  %v254_v16 = vadd.f32 1e-07, %v701_v36  ;;  %362 = vst [vmem:[#allocation10 + $0x18] sm:$0xff] %v360_v23 }
  0x37   :  { %347 = vst [vmem:[#allocation10] sm:$0xff] %v345_v34  ;;  %v711_v45 = vmul.f32 %v298_v22, %v292_v10  ;;  %v713_v40 = vmul.f32 %v299_v26, %v293_v0 }
  0x38   :  { %v255_v24 = vadd.f32 1e-07, %v705_v33  ;;  %v256_v13 = vsel %vm127_vm0, %v254_v16, 1.0 }
  0x39   :  { %403 = vrcp.f32 %v256_v13  ;;  %v304_v46 = vadd.f32 1e-07, %v711_v45  ;;  %v305_v48 = vadd.f32 1e-07, %v713_v40  ;;  %v267_v54 = vand.u32 2147483647, %v256_v13 }
  0x3a   :  { %v257_v14 = vsel %vm128_vm1, %v255_v24, 1.0  ;;  %v269_v55 = vand.u32 2147483648, %v256_v13  ;;  %vm263_vm3 = vweird.f32 %v256_v13  ;;  %v302_v42 = vsub.f32 %v711_v45, %v701_v36 }
  0x3b   :  { %405 = vrcp.f32 %v257_v14  ;;  %v306_v49 = vsel %vm127_vm0, %v304_v46, 1.0  ;;  %v307_v50 = vsel %vm128_vm1, %v305_v48, 1.0  ;;  %v282_v43 = vand.u32 2147483647, %v257_v14 }
  0x3c   :  { %407 = vrcp.f32 %v306_v49  ;;  %v284_v29 = vand.u32 2147483648, %v257_v14  ;;  %vm278_vm5 = vweird.f32 %v257_v14  ;;  %vm725_vm7 = vcmp.eq.f32.partialorder %v267_v54, 8.507059e+37 }
  0x3d   :  { %409 = vrcp.f32 %v307_v50  ;;  %v270_v61 = vor.u32 1.1754944e-38, %v269_v55  ;;  %vm733_vm9 = vcmp.eq.f32.partialorder %v282_v43, 8.507059e+37  ;;  %vm313_vm11 = vweird.f32 %v306_v49 }
  0x3e   :  { %v285_v2 = vor.u32 1.1754944e-38, %v284_v29  ;;  %v317_v11 = vand.u32 2147483647, %v306_v49  ;;  %v319_v21 = vand.u32 2147483648, %v306_v49  ;;  %vm328_vm12 = vweird.f32 %v307_v50 }
  0x3f   :  { %v404_v51 = vpop.eup %403  ;;  %v334_v31 = vand.u32 2147483648, %v307_v50  ;;  %v332_v38 = vand.u32 2147483647, %v307_v50  ;;  %v303_v10 = vsub.f32 %v713_v40, %v705_v33 }
  0x40   :  { %v259_v53 = vmul.f32 %v404_v51, %v256_v13  ;;  %vm264_vm4 = vweird.f32 %v404_v51  ;;  %v320_v44 = vor.u32 1.1754944e-38, %v319_v21  ;;  %vm318_vm2 = vcmp.eq.f32.partialorder %v317_v11, 8.507059e+37 }
  0x41   :  { %v406_v52 = vpop.eup %405  ;;  %vm729_vm8 = vmor %vm263_vm3, %vm264_vm4  ;;  %v335_v25 = vor.u32 1.1754944e-38, %v334_v31  ;;  %vm333_vm4 = vcmp.eq.f32.partialorder %v332_v38, 8.507059e+37 }
  0x42   :  { %v274_v37 = vmul.f32 %v406_v52, %v257_v14  ;;  %v260_v41 = vsub.f32 1.0, %v259_v53  ;;  %vm279_vm6 = vweird.f32 %v406_v52  ;;  %v408_v59 = vpop.eup %407 }
  0x43   :  { %v410_v3 = vpop.eup %409  ;;  %vm737_vm10 = vmor %vm278_vm5, %vm279_vm6  ;;  %v309_v6 = vmul.f32 %v408_v59, %v306_v49  ;;  %vm314_vm13 = vweird.f32 %v408_v59 }
  0x44   :  { %v275_v56 = vsub.f32 1.0, %v274_v37  ;;  %v261_v57 = vmul.f32 %v404_v51, %v260_v41  ;;  %v324_v17 = vmul.f32 %v410_v3, %v307_v50  ;;  %vm329_vm14 = vweird.f32 %v410_v3  ;;  %vm315_vm15 = vmor %vm313_vm11, %vm314_vm13 }
  0x45   :  { %v310_v27 = vsub.f32 1.0, %v309_v6  ;;  %vm330_vm3 = vmor %vm328_vm12, %vm329_vm14 }
  0x46   :  { %v276_v62 = vmul.f32 %v406_v52, %v275_v56  ;;  %v262_v4 = vadd.f32 %v404_v51, %v261_v57  ;;  %v325_v18 = vsub.f32 1.0, %v324_v17 }
  0x47   :  { %v311_v39 = vmul.f32 %v408_v59, %v310_v27 }
  0x48   :  { %v277_v12 = vadd.f32 %v406_v52, %v276_v62  ;;  %v266_v30 = vsel %vm729_vm8, %v404_v51, %v262_v4  ;;  %v326_v15 = vmul.f32 %v410_v3, %v325_v18 }
  0x49   :  { %v271_v28 = vsel %vm725_vm7, %v270_v61, %v266_v30  ;;  %v312_v19 = vadd.f32 %v408_v59, %v311_v39 }
  0x4a   :  { %v281_v35 = vsel %vm737_vm10, %v406_v52, %v277_v12  ;;  %v327_v32 = vadd.f32 %v410_v3, %v326_v15  ;;  %v272_v34 = vmul.f32 %v271_v28, %v693_v47 }
  0x4b   :  { %v286_v20 = vsel %vm733_vm9, %v285_v2, %v281_v35  ;;  %v316_v36 = vsel %vm315_vm15, %v408_v59, %v312_v19 }
  0x4c   :  { %v287_v0 = vmul.f32 %v286_v20, %v697_v1  ;;  %v321_v9 = vsel %vm318_vm2, %v320_v44, %v316_v36  ;;  %v331_v22 = vsel %vm330_vm3, %v410_v3, %v327_v32 }
  0x4d   :  { %v322_v16 = vmul.f32 %v321_v9, %v302_v42  ;;  %v336_v26 = vsel %vm333_vm4, %v335_v25, %v331_v22 }
  0x4e   :  { %v337_v24 = vmul.f32 %v336_v26, %v303_v10 }
  0x4f   :  { %v338_v13 = vsub.f32 %v272_v34, %v322_v16 }
  0x50   :  { %v339_v45 = vsub.f32 %v287_v0, %v337_v24 }
  0x51   :  { %v340_v14 = vsub.f32 1.0, %v338_v13 }
  0x52   :  { %v341_v23 = vsub.f32 1.0, %v339_v45 }
  0x53   :  { %v342_v46 = vsel %vm127_vm0, %v340_v14, 0.0 }
  0x54   :  { %v343_v33 = vsel %vm128_vm1, %v341_v23, 0.0 }
  0x55   :  { %v355_v47 = vadd.f32 %v343_v33, %v342_v46 }
  0x57   :  { %357 = vst [vmem:[#allocation10 + $0x10] sm:$0xff] %v355_v47 }
  0x58   :  { %375 = dma.vmem_to_hbm [thread:$0]  %s368_s8, 512, %s370_s11, [#allocation4], %s540_s23, %s540_s23, %s541_s24  }
  0x59   :  { %537 = dma.done.wait [#allocation4], 512  }
  0x5a   :  { %538 = vsyncadd [#allocation4], 4294966784 }
  0x5b   :  { %380 = vsyncpa [#allocation3], 1 }
  0x5c   :  { %381 = vsyncpa [#allocation6], 1 }
  0x5d   :  { %382 = vsyncpa [#allocation9], 1 }
  0x5e   :  { %383 = vsyncpa [#allocation4], 1 }

</bundles_post_ra>
